<compile_context>
chip_gen: v6e
topology: v6e:2x2x1
jax: 0.10.0
libtpu: 0.0.40
codegen_flags: <defaults>
</compile_context>

<pallas_src>
import jax
import jax.numpy as jnp
from jax.experimental import pallas as pl
from jax.experimental.pallas import tpu as pltpu

_LANE = 128      # vreg lane width
_SUBLANE = 8     # vreg sublane count (f32)


def _round_up(x, m):
    return (x + m - 1) // m * m


def _vmem_tile_bytes(rows, cols, itemsize):
    # VMEM footprint of a (rows, cols) tile after (8, 128) layout rounding.
    return _round_up(max(rows, 1), _SUBLANE) * _round_up(max(cols, 1), _LANE) * itemsize


def _head_kernel(x_ref, w1_ref, b1_ref, w2_ref, b2_ref, o_ref):
    # x: [tb, d_in], w1: [d_in, H], b1: [1, H], w2: [H, C], b2: [1, C], o: [tb, C]
    # Cast x to the weight/compute dtype in-vreg (no wrapper-side copy of x).
    x = x_ref[...].astype(w1_ref.dtype)
    # dense: x @ W1 on the MXU with f32 accumulation.
    h = jnp.dot(x, w1_ref[...], preferred_element_type=jnp.float32)
    # bias add + tanh kept in f32 (safe on v5e's f32-only VPU/EUP; cheap everywhere).
    h = jnp.tanh(h + b1_ref[...])
    # out_proj: h @ W2 + b2 (cast back to the weight dtype for the MXU path).
    out = jnp.dot(h.astype(w2_ref.dtype), w2_ref[...],
                  preferred_element_type=jnp.float32) + b2_ref[...]
    o_ref[...] = out.astype(o_ref.dtype)


def prepare_head_params(w1, b1, w2, b2, compute_dtype=jnp.bfloat16):
    """One-time (model-load) parameter prep, hoisted out of the per-call path.

    w1: [input_dim, inner_dim], w2: [inner_dim, num_classes]  (i.e. the transpose
    of PyTorch nn.Linear's [out, in] weight layout), b1/b2: 1-D biases.
    Weights are cast to `compute_dtype` (bf16 by default: halves weight DMA bytes
    on v6e/v7x, still fine on v5e's MXU); biases stay f32 and become row vectors.
    """
    cdt = jnp.dtype(compute_dtype)
    return (w1.astype(cdt),
            b1.astype(jnp.float32).reshape(1, -1),
            w2.astype(cdt),
            b2.astype(jnp.float32).reshape(1, -1))


def classification_head(features, w1, b1, w2, b2, *, tile_b=1024):
    """features: [B, input_dim] -> [B, num_classes].

    w1/b1/w2/b2 must come from `prepare_head_params` (pre-cast, biases as [1, D]).
    The kernel fuses dense -> tanh -> out_proj; weights stay VMEM-resident and the
    batch axis is tiled (and megacore-shardable on v7x).
    """
    B, d_in = features.shape
    d_inner = w1.shape[1]
    n_cls = w2.shape[1]
    out_dtype = features.dtype
    w_item = jnp.dtype(w1.dtype).itemsize
    x_item = jnp.dtype(features.dtype).itemsize
    o_item = jnp.dtype(out_dtype).itemsize

    # --- batch tiling ---------------------------------------------------------
    # Biggest tile up to tile_b (multiple of 8 sublanes), never larger than the
    # (rounded) batch. Prefer >=2 grid steps so ("parallel",) can shard across
    # v7x's two TensorCores, but never shrink tiles below ~256 rows (DMA knee).
    tb = max(_SUBLANE, min(_round_up(tile_b, _SUBLANE), _round_up(B, _SUBLANE)))
    half = _round_up(pl.cdiv(B, 2), _SUBLANE)
    if half >= 256:
        tb = min(tb, half)
    grid = (pl.cdiv(B, tb),)

    # --- VMEM budget (sized against v7x's 64 MiB VMEM / 32 MiB scoped default) -
    # Inputs are double-buffered by default, so resident weights/biases are
    # counted at 2x (honest accounting instead of hiding it in a fudge factor).
    # TODO(synk): pipeline_mode=pl.Buffered(1) on the constant-index weight specs
    # would drop the redundant second weight buffer on v7x.
    est = (2 * _vmem_tile_bytes(tb, d_in, x_item)        # x tiles (double-buffered)
           + 2 * _vmem_tile_bytes(tb, n_cls, o_item)     # out tiles (double-buffered)
           + 2 * (_vmem_tile_bytes(d_in, d_inner, w_item)
                  + _vmem_tile_bytes(d_inner, n_cls, w_item)
                  + _vmem_tile_bytes(1, d_inner, 4)
                  + _vmem_tile_bytes(1, n_cls, 4))       # resident weights/biases (x2)
           + 2 * _vmem_tile_bytes(tb, d_inner, 4))       # f32 intermediate h
    vmem_limit = int(min(max(2 * est, 16 << 20), 32 << 20))

    cost = pl.CostEstimate(
        flops=2 * B * (d_in * d_inner + d_inner * n_cls),
        transcendentals=B * d_inner,
        bytes_accessed=(B * d_in * x_item
                        + (d_in * d_inner + d_inner * n_cls) * w_item
                        + (d_inner + n_cls) * 4
                        + B * n_cls * o_item),
    )

    return pl.pallas_call(
        _head_kernel,
        out_shape=jax.ShapeDtypeStruct((B, n_cls), out_dtype),
        grid=grid,
        in_specs=[
            pl.BlockSpec((tb, d_in), lambda i: (i, 0)),      # x: tiled over batch
            pl.BlockSpec((d_in, d_inner), lambda i: (0, 0)),  # w1: resident
            pl.BlockSpec((1, d_inner), lambda i: (0, 0)),     # b1: resident
            pl.BlockSpec((d_inner, n_cls), lambda i: (0, 0)), # w2: resident
            pl.BlockSpec((1, n_cls), lambda i: (0, 0)),       # b2: resident
        ],
        out_specs=pl.BlockSpec((tb, n_cls), lambda i: (i, 0)),  # unpadded output
        compiler_params=pltpu.CompilerParams(
            dimension_semantics=("parallel",),   # shard batch across TCs (v7x)
            vmem_limit_bytes=vmem_limit,
        ),
        cost_estimate=cost,
    )(features, w1, b1, w2, b2)


def _ref(features, w1, b1, w2, b2):
    return jnp.tanh(features @ w1 + b1) @ w2 + b2


if __name__ == "__main__":
    # Module hyperparameters (small, consistent with the forward pass).
    batch = 8
    input_dim = 32
    inner_dim = 32
    num_classes = 8

    key = jax.random.PRNGKey(0)
    k_x, k_w1, k_b1, k_w2, k_b2, k_x2 = jax.random.split(key, 6)

    features = jax.random.normal(k_x, (batch, input_dim), dtype=jnp.float32)

    # Deterministic synthetic parameters.
    # (Stored as [in, out], i.e. the transpose of PyTorch's nn.Linear weight.)
    w1 = jax.random.normal(k_w1, (input_dim, inner_dim), dtype=jnp.float32) * 0.05
    b1 = jax.random.normal(k_b1, (inner_dim,), dtype=jnp.float32) * 0.01
    w2 = jax.random.normal(k_w2, (inner_dim, num_classes), dtype=jnp.float32) * 0.05
    b2 = jax.random.normal(k_b2, (num_classes,), dtype=jnp.float32) * 0.01

    ref_small = _ref(features, w1, b1, w2, b2)

    # 1) f32 compute path, single grid step — strict tolerance.
    p_f32 = prepare_head_params(w1, b1, w2, b2, compute_dtype=jnp.float32)
    out = jax.block_until_ready(classification_head(features, *p_f32))
    assert out.shape == (batch, num_classes)
    assert jnp.allclose(out, ref_small, atol=1e-5, rtol=1e-5), "f32 mismatch vs reference"

    # 2) f32 path with a multi-step batch grid + non-divisible edge block (B=300).
    features_big = jax.random.normal(k_x2, (300, input_dim), dtype=jnp.float32)
    ref_big = _ref(features_big, w1, b1, w2, b2)
    out_big = jax.block_until_ready(
        classification_head(features_big, *p_f32, tile_b=128))
    assert out_big.shape == (300, num_classes)
    assert jnp.allclose(out_big, ref_big, atol=1e-5, rtol=1e-5), "tiled mismatch"

    # 3) Default bf16 compute path (halved weight/MXU DMA bytes) — loose tolerance.
    p_bf16 = prepare_head_params(w1, b1, w2, b2)   # default compute_dtype=bf16
    out_bf16 = jax.block_until_ready(
        classification_head(features_big, *p_bf16, tile_b=128))
    assert out_bf16.shape == (300, num_classes)
    assert jnp.allclose(out_bf16, ref_big, atol=5e-2, rtol=5e-2), "bf16 mismatch"

    print("KERNEL_OK")
</pallas_src>

<mosaic_0001>
module attributes {stable_mosaic.version = 11 : i64} {
  func.func @_head_kernel(%arg0: i32, %arg1: memref<8x32xf32, #tpu.memory_space<vmem>>, %arg2: memref<32x32xf32, #tpu.memory_space<vmem>>, %arg3: memref<1x32xf32, #tpu.memory_space<vmem>>, %arg4: memref<32x8xf32, #tpu.memory_space<vmem>>, %arg5: memref<1x8xf32, #tpu.memory_space<vmem>>, %arg6: memref<8x8xf32, #tpu.memory_space<vmem>>) attributes {dimension_semantics = [#tpu.dimension_semantics<parallel>], iteration_bounds = array<i64: 1>, scalar_prefetch = 0 : i64, scratch_operands = 0 : i64, tpu.core_type = #tpu.core_type<tc>, window_params = [{transform_indices = @transform_0, window_bounds = array<i64: 8, 32>}, {pipeline_mode = #tpu.pipeline_mode<synchronous>, transform_indices = @transform_1, window_bounds = array<i64: 32, 32>}, {pipeline_mode = #tpu.pipeline_mode<synchronous>, transform_indices = @transform_2, window_bounds = array<i64: 1, 32>}, {pipeline_mode = #tpu.pipeline_mode<synchronous>, transform_indices = @transform_3, window_bounds = array<i64: 32, 8>}, {pipeline_mode = #tpu.pipeline_mode<synchronous>, transform_indices = @transform_4, window_bounds = array<i64: 1, 8>}, {transform_indices = @transform_5, window_bounds = array<i64: 8, 8>}]} {
    %c0 = arith.constant 0 : index
    %c0_0 = arith.constant 0 : index
    %0 = vector.load %arg1[%c0, %c0_0] : memref<8x32xf32, #tpu.memory_space<vmem>>, vector<8x32xf32>
    %c0_1 = arith.constant 0 : index
    %c0_2 = arith.constant 0 : index
    %1 = vector.load %arg2[%c0_1, %c0_2] : memref<32x32xf32, #tpu.memory_space<vmem>>, vector<32x32xf32>
    %cst = arith.constant dense<0.000000e+00> : vector<8x32xf32>
    %2 = tpu.matmul %0, %1, %cst {dimension_numbers = #tpu.dot_dimension_numbers<[1], [0], [0], [1], [0, 0, 1, 1], [], []>} : vector<8x32xf32>, vector<32x32xf32>, vector<8x32xf32> -> vector<8x32xf32>
    %c0_3 = arith.constant 0 : index
    %c0_4 = arith.constant 0 : index
    %3 = vector.load %arg3[%c0_3, %c0_4] : memref<1x32xf32, #tpu.memory_space<vmem>>, vector<1x32xf32>
    %4 = vector.broadcast %3 : vector<1x32xf32> to vector<8x32xf32>
    %5 = arith.addf %2, %4 : vector<8x32xf32>
    %6 = math.tanh %5 : vector<8x32xf32>
    %c0_5 = arith.constant 0 : index
    %c0_6 = arith.constant 0 : index
    %7 = vector.load %arg4[%c0_5, %c0_6] : memref<32x8xf32, #tpu.memory_space<vmem>>, vector<32x8xf32>
    %cst_7 = arith.constant dense<0.000000e+00> : vector<8x8xf32>
    %8 = tpu.matmul %6, %7, %cst_7 {dimension_numbers = #tpu.dot_dimension_numbers<[1], [0], [0], [1], [0, 0, 1, 1], [], []>} : vector<8x32xf32>, vector<32x8xf32>, vector<8x8xf32> -> vector<8x8xf32>
    %c0_8 = arith.constant 0 : index
    %c0_9 = arith.constant 0 : index
    %9 = vector.load %arg5[%c0_8, %c0_9] : memref<1x8xf32, #tpu.memory_space<vmem>>, vector<1x8xf32>
    %10 = vector.broadcast %9 : vector<1x8xf32> to vector<8x8xf32>
    %11 = arith.addf %8, %10 : vector<8x8xf32>
    %c0_10 = arith.constant 0 : index
    %c0_11 = arith.constant 0 : index
    %12 = vector.load %arg6[%c0_10, %c0_11] : memref<8x8xf32, #tpu.memory_space<vmem>>, vector<8x8xf32>
    tpu.vector_store %arg6[%c0_10, %c0_11], %11 {strides = array<i32>} : memref<8x8xf32, #tpu.memory_space<vmem>>, vector<8x8xf32>,
    return
  }
  func.func @transform_0(%arg0: i32) -> (i32, i32) {
    %c0_i32 = arith.constant 0 : i32
    %c0_i32_0 = arith.constant 0 : i32
    return %arg0, %c0_i32 : i32, i32
  }
  func.func @transform_1(%arg0: i32) -> (i32, i32) {
    %c0_i32 = arith.constant 0 : i32
    %c0_i32_0 = arith.constant 0 : i32
    %c0_i32_1 = arith.constant 0 : i32
    return %c0_i32, %c0_i32_0 : i32, i32
  }
  func.func @transform_2(%arg0: i32) -> (i32, i32) {
    %c0_i32 = arith.constant 0 : i32
    %c0_i32_0 = arith.constant 0 : i32
    %c0_i32_1 = arith.constant 0 : i32
    return %c0_i32, %c0_i32_0 : i32, i32
  }
  func.func @transform_3(%arg0: i32) -> (i32, i32) {
    %c0_i32 = arith.constant 0 : i32
    %c0_i32_0 = arith.constant 0 : i32
    %c0_i32_1 = arith.constant 0 : i32
    return %c0_i32, %c0_i32_0 : i32, i32
  }
  func.func @transform_4(%arg0: i32) -> (i32, i32) {
    %c0_i32 = arith.constant 0 : i32
    %c0_i32_0 = arith.constant 0 : i32
    %c0_i32_1 = arith.constant 0 : i32
    return %c0_i32, %c0_i32_0 : i32, i32
  }
  func.func @transform_5(%arg0: i32) -> (i32, i32) {
    %c0_i32 = arith.constant 0 : i32
    %c0_i32_0 = arith.constant 0 : i32
    return %arg0, %c0_i32 : i32, i32
  }
}

</mosaic_0001>

<bundles_post_ra>
// kernel: tpu_custom_call.1
= control target key start
LH: loop header
LB: loop body
LE: loop exit
PB: predicated region body
PF: predicated region fallthrough
CT: control target
= control target key end

     0   :  { %v271_v1 = vmov 0.0   ;;  %vm272_vm0 = vmmov 0   ;;  %s342_s0 = inlined_call_operand.vmem [shape: f32[8,32], index: 0, kind: input, shape index: {}]   ;;  %s343_s1 = inlined_call_operand.vmem [shape: f32[32,32], index: 1, kind: input, shape index: {}]   ;;  %s344_s2 = inlined_call_operand.vmem [shape: f32[1,32], index: 2, kind: input, shape index: {}]   ;;  %s345_s3 = inlined_call_operand.vmem [shape: f32[32,8], index: 3, kind: input, shape index: {}]   ;;  %s346_s4 = inlined_call_operand.vmem [shape: f32[1,8], index: 4, kind: input, shape index: {}]   ;;  %s347_s5 = inlined_call_operand.hbm [shape: f32[8,8], index: 5, kind: output, shape index: {}]  }
   0x1   :  { %v25_v0 = vld [vmem:[%s343_s1 + $0x18] sm:$0xff]  ;;  %222 = vmatprep.subr.mxu0 %v271_v1  ;;  %v24_v2 = vld [vmem:[%s343_s1 + $0x10] sm:$0xff]  ;;  %230 = vmatprep.mubr.msk.f32.mxu0 %vm272_vm0, %v271_v1 }
   0x2   :  { %223 = vmatpush3.msra.mxu0 %v25_v0  ;;  %233 = vmatprep.subr.mxu1 %v271_v1 }
   0x3   :  { %10 = vsyncpa [#allocation3], 0  ;;  %224 = vmatprep.subr.mxu0 %v271_v1  ;;  %v23_v3 = vld [vmem:[%s343_s1 + $0x8] sm:$0xff]  ;;  %241 = vmatprep.mubr.msk.f32.mxu1 %vm272_vm0, %v271_v1  ;;  %v22_v4 = vld [vmem:[%s343_s1] sm:$0xff]  ;;  %vm33_vm1 = vcmask 261120   ;;  %s273_s13 = smov [#allocation2]  }
   0x4   :  { %225 = vmatpush3.msra.mxu0 %v24_v2  ;;  %v21_v5 = vld [vmem:[%s342_s0] sm:$0xff]  ;;  %v111_v6 = vld [vmem:[%s345_s3 + $0x18] sm:$0xff]  ;;  %v110_v7 = vld [vmem:[%s345_s3 + $0x10] sm:$0xff]  ;;  %vm192_vm2 = vcmask 64512  }
   0x5   :  { %226 = vmatprep.subr.mxu0 %v271_v1  ;;  %234 = vmatpush3.msra.mxu1 %v111_v6  ;;  %v109_v8 = vld [vmem:[%s345_s3 + $0x8] sm:$0xff]  ;;  %v108_v9 = vld [vmem:[%s345_s3] sm:$0xff]  ;;  %s200_s3 = sshll.u32 %s273_s13, 4  ;;  %s201_s3 = int_to_ptr.vmem [resolvable:$true] %s200_s3 }
   0x6   :  { %227 = vmatpush3.msra.mxu0 %v23_v3  ;;  %235 = vmatprep.subr.mxu1 %v271_v1  ;;  %v208_v10 = vld [vmem:[%s344_s2] ss:$0 sm:$0xff]  ;;  %s249_s2 = scalar_lea.vmem %s201_s3, 128  ;;  %p254_p1 = scmp.lt.s32.totalorder %s201_s3, %s201_s3 }
   0x7   :  { %228 = vmatprep.subr.mxu0 %v271_v1  ;;  %236 = vmatpush3.msra.mxu1 %v110_v7  ;;  %v210_v15 = vld [vmem:[%s346_s4] ss:$0 sm:$0xff]  ;;  %p250_p0 = scmp.ne.s32.totalorder %s201_s3, %s249_s2  ;;  %p255_p2 = scmp.lt.s32.totalorder %s249_s2, %s249_s2 }
   0x8   :  { %229 = vmatpush3.msra.mxu0 %v22_v4  ;;  %237 = vmatprep.subr.mxu1 %v271_v1 }
   0x9   :  { %231 = vmatmul.mubr.msk.f32.vlgmr.msra.gmra.mxu0 %vm33_vm1, %v21_v5  ;;  %238 = vmatpush3.msra.mxu1 %v109_v8  ;;  %p256_p3 = por %p255_p2, %p254_p1 }
   0xa   :  { %239 = vmatprep.subr.mxu1 %v271_v1 }
   0xb   :  { %240 = vmatpush3.msra.mxu1 %v108_v9  ;;  %p257_p4 = pnand %p256_p3, %p250_p0 }
  0xc9   :  { %v103_v11 = vpop.f32.mrf.mxu0 }
  0xca   :  { %v104_v12 = vadd.f32 %v208_v10, %v103_v11 }
  0xcb   :  { %v232_v13 = vpop.f32.mrf.mxu0 }
  0xcc   :  { %247 = vtanh.f32 %v104_v12 }
  0xd9   :  { %v248_v14 = vpop.eup %247 }
  0xda   :  { %242 = vmatmul.mubr.msk.f32.vlgmr.msra.gmra.mxu1 %vm33_vm1, %v248_v14 }
 0x19a   :  { %v188_v16 = vpop.f32.mrf.mxu1 }
 0x19b   :  { %v189_v17 = vadd.f32 %v210_v15, %v188_v16 }
 0x19c   :  { %v243_v18 = vpop.f32.mrf.mxu1 }
 0x19d   :  { %193 = vst.msk [vmem:[#allocation2] sm:$0xff] %vm192_vm2, %v189_v17 }
 0x19e   :  { %260 = shalt.err (!%p257_p4)
}
 0x19f   :  { %203 = dma.vmem_to_hbm [thread:$0]  %s201_s3, 128, %s347_s5, [#allocation3]  }
 0x1a0   :  { %269 = dma.done.wait [#allocation3], 128  }
 0x1a1   :  { %270 = vsyncadd [#allocation3], 4294967168 }
 0x1a2   :  { %207 = vsyncpa [#allocation3], 1 }

</bundles_post_ra>
